<compile_context>
chip_gen: v5e
topology: v5e:2x2
jax: 0.10.0
libtpu: 0.0.40
codegen_flags: <defaults>
</compile_context>

<pallas_src>
import jax
import jax.numpy as jnp
from jax.experimental import pallas as pl
from jax.experimental.pallas import tpu as pltpu


# ---------------------------------------------------------------------------
# Stage 1: start/end projection MLPs (halves computed sequentially).
# ---------------------------------------------------------------------------
def _project_kernel(h_ref, ws1_ref, bs1_ref, ws2_ref, bs2_ref,
                    we1_ref, be1_ref, we2_ref, be2_ref,
                    srep_ref, erep_ref):
    f32, bf16 = jnp.float32, jnp.bfloat16
    hb = h_ref[0].astype(bf16)                                  # (lt, D) bf16

    # Start half first, end half second: only one (lt, 4D) f32 hidden is live
    # at a time (halves spill pressure vs. a fused (lt, 8D) intermediate).
    s_hid = jnp.dot(hb, ws1_ref[...], preferred_element_type=f32) + bs1_ref[...]
    s_hid = jnp.maximum(s_hid, 0.0).astype(bf16)
    srep = jnp.dot(s_hid, ws2_ref[...], preferred_element_type=f32) + bs2_ref[...]
    srep_ref[0] = srep.astype(srep_ref.dtype)

    e_hid = jnp.dot(hb, we1_ref[...], preferred_element_type=f32) + be1_ref[...]
    e_hid = jnp.maximum(e_hid, 0.0).astype(bf16)
    erep = jnp.dot(e_hid, we2_ref[...], preferred_element_type=f32) + be2_ref[...]
    erep_ref[0] = erep.astype(erep_ref.dtype)


# ---------------------------------------------------------------------------
# Stage 2: span-endpoint gather (one-hot matmul, L-chunked reduction) +
#          out_project at the final chunk.
# ---------------------------------------------------------------------------
def _span_out_kernel(idx_ref, srep_ref, erep_ref,
                     wo1a_ref, wo1b_ref, bo1_ref, wo2_ref, bo2_ref,
                     out_ref, s_acc, e_acc):
    f32, bf16 = jnp.float32, jnp.bfloat16
    lc_i = pl.program_id(2)
    n_lc = pl.num_programs(2)

    @pl.when(lc_i == 0)
    def _():
        s_acc[...] = jnp.zeros_like(s_acc)
        e_acc[...] = jnp.zeros_like(e_acc)

    srep = srep_ref[0]                          # (lc, D) bf16
    erep = erep_ref[0]
    lc = srep.shape[0]
    idx = idx_ref[0]                            # (st, 2) int32
    st = idx.shape[0]
    base = lc_i * lc

    # One-hot gather restricted to this L chunk (exact in bf16: values 0/1).
    # Indices are clamped to [0, L) in the wrapper (torch.gather would raise
    # on out-of-range indices).
    col = jax.lax.broadcasted_iota(jnp.int32, (st, lc), 1) + base
    onehot_s = (col == idx[:, 0:1]).astype(bf16)
    onehot_e = (col == idx[:, 1:2]).astype(bf16)
    s_acc[...] += jnp.dot(onehot_s, srep, preferred_element_type=f32)
    e_acc[...] += jnp.dot(onehot_e, erep, preferred_element_type=f32)

    @pl.when(lc_i == n_lc - 1)
    def _():
        # relu(concat([s, e], -1)) @ wo1 == relu(s) @ wo1[:D] + relu(e) @ wo1[D:]
        ss = jnp.maximum(s_acc[...], 0.0).astype(bf16)
        ee = jnp.maximum(e_acc[...], 0.0).astype(bf16)
        o_hid = (jnp.dot(ss, wo1a_ref[...], preferred_element_type=f32)
                 + jnp.dot(ee, wo1b_ref[...], preferred_element_type=f32)
                 + bo1_ref[...])
        o_hid = jnp.maximum(o_hid, 0.0).astype(bf16)
        out = jnp.dot(o_hid, wo2_ref[...], preferred_element_type=f32) + bo2_ref[...]
        out_ref[0] = out.astype(out_ref.dtype)


# ---------------------------------------------------------------------------
# Wrapper helpers.
# ---------------------------------------------------------------------------
def _round_up(n, m):
    return ((n + m - 1) // m) * m


def _tpu_vmem_bytes():
    try:
        return int(pltpu.get_tpu_info().vmem_capacity_bytes)
    except Exception:
        return 64 << 20          # assume the smallest (v7x-class) if unknown


def _wspec(arr):
    """Whole-array BlockSpec for a weight (constant block index)."""
    nd = arr.ndim
    return pl.BlockSpec(arr.shape, lambda *_: (0,) * nd)


def init_params(key, hidden_size):
    """Deterministic init of the three projection MLPs (PyTorch-Linear-style uniform)."""
    D = hidden_size
    H = 4 * D

    def lin(k, fan_in, fan_out):
        kw, kb = jax.random.split(k)
        bound = 1.0 / (fan_in ** 0.5)
        w = jax.random.uniform(kw, (fan_in, fan_out), jnp.float32, -bound, bound)
        b = jax.random.uniform(kb, (1, fan_out), jnp.float32, -bound, bound)
        return w, b

    keys = jax.random.split(key, 6)
    ws1, bs1 = lin(keys[0], D, H)       # project_start
    ws2, bs2 = lin(keys[1], H, D)
    we1, be1 = lin(keys[2], D, H)       # project_end
    we2, be2 = lin(keys[3], H, D)
    wo1, bo1 = lin(keys[4], 2 * D, H)   # out_project
    wo2, bo2 = lin(keys[5], H, D)
    return (ws1, bs1, ws2, bs2, we1, be1, we2, be2, wo1, bo1, wo2, bo2)


def span_rep_layer(h, span_idx, params, max_width, *,
                   l_tile=None, s_tile=None, vmem_limit_bytes=None):
    """h: (B, L, D) float; span_idx: (B, L*max_width, 2) int. Returns (B, L, W, D)."""
    (ws1, bs1, ws2, bs2, we1, be1, we2, be2, wo1, bo1, wo2, bo2) = params
    B, L, D = h.shape
    S = span_idx.shape[1]
    assert S == L * max_width, "span_idx must carry L * max_width spans"

    bf16, f32 = jnp.bfloat16, jnp.float32

    # --- generation-aware tiling / VMEM budget ------------------------------
    cap = _tpu_vmem_bytes()
    if cap >= (96 << 20):                # 128 MiB parts (v5e / v6e): big tiles
        lt_t, st_t = 512, 1024
        default_limit = 100 << 20
    else:                                # 64 MiB parts (v7x) or unknown
        lt_t, st_t = 256, 384
        default_limit = 40 << 20
    default_limit = min(default_limit, int(cap * 0.8))
    if B == 1:
        # Keep >= 2 parallel grid steps so both v7x TensorCores get work.
        lt_t = max(8, min(lt_t, _round_up(-(-L // 2), 8)))
        st_t = max(8, min(st_t, _round_up(-(-S // 2), 8)))
    vmem_limit_bytes = vmem_limit_bytes or max(default_limit, 8 << 20)

    lt = l_tile or (L if L <= lt_t else lt_t)
    st = s_tile or (S if S <= st_t else st_t)
    L_pad = _round_up(L, lt)
    S_pad = _round_up(S, st)
    lc = lt                              # stage-2 L chunk (divides L_pad)

    # --- weights: bf16 MXU operands, f32 biases ------------------------------
    ws1b, ws2b = ws1.astype(bf16), ws2.astype(bf16)
    we1b, we2b = we1.astype(bf16), we2.astype(bf16)
    wo1a, wo1b = wo1[:D].astype(bf16), wo1[D:].astype(bf16)   # pre-split halves
    wo2b = wo2.astype(bf16)
    bs1f, bs2f = bs1.astype(f32), bs2.astype(f32)
    be1f, be2f = be1.astype(f32), be2.astype(f32)
    bo1f, bo2f = bo1.astype(f32), bo2.astype(f32)

    # --- pad L and S to tile multiples (no silent whole-dim tiles) -----------
    h_p = h if L_pad == L else jnp.pad(h, ((0, 0), (0, L_pad - L), (0, 0)))
    # torch.gather would raise on out-of-range indices; we clamp instead.
    idx = jnp.clip(span_idx.astype(jnp.int32), 0, L - 1)
    idx_p = idx if S_pad == S else jnp.pad(idx, ((0, 0), (0, S_pad - S), (0, 0)))

    cparams1 = pltpu.CompilerParams(
        dimension_semantics=("parallel", "parallel"),
        vmem_limit_bytes=vmem_limit_bytes)
    cparams2 = pltpu.CompilerParams(
        dimension_semantics=("parallel", "parallel", "arbitrary"),
        vmem_limit_bytes=vmem_limit_bytes)

    # ---- Stage 1: per-token start/end projection MLPs -----------------------
    w1_bytes = sum(int(x.size) * 2 for x in (ws1b, ws2b, we1b, we2b)) \
             + sum(int(x.size) * 4 for x in (bs1f, bs2f, be1f, be2f))
    ce1 = pl.CostEstimate(
        flops=int(32 * B * L_pad * D * D),
        transcendentals=0,
        bytes_accessed=int(B * L_pad * D * h.dtype.itemsize
                           + 2 * B * L_pad * D * 2 + w1_bytes))

    srep, erep = pl.pallas_call(
        _project_kernel,
        out_shape=(jax.ShapeDtypeStruct((B, L_pad, D), bf16),
                   jax.ShapeDtypeStruct((B, L_pad, D), bf16)),
        grid_spec=pltpu.PrefetchScalarGridSpec(
            num_scalar_prefetch=0,
            grid=(B, L_pad // lt),
            in_specs=[pl.BlockSpec((1, lt, D), lambda b, l: (b, l, 0)),
                      _wspec(ws1b), _wspec(bs1f), _wspec(ws2b), _wspec(bs2f),
                      _wspec(we1b), _wspec(be1f), _wspec(we2b), _wspec(be2f)],
            out_specs=[pl.BlockSpec((1, lt, D), lambda b, l: (b, l, 0)),
                       pl.BlockSpec((1, lt, D), lambda b, l: (b, l, 0))]),
        compiler_params=cparams1,
        cost_estimate=ce1,
    )(h_p, ws1b, bs1f, ws2b, bs2f, we1b, be1f, we2b, be2f)

    # ---- Stage 2: L-chunked gather + out_project, tiled over spans ----------
    w2_bytes = sum(int(x.size) * 2 for x in (wo1a, wo1b, wo2b)) \
             + sum(int(x.size) * 4 for x in (bo1f, bo2f))
    ce2 = pl.CostEstimate(
        flops=int(B * S_pad * (4 * L_pad * D + 24 * D * D)),
        transcendentals=0,
        bytes_accessed=int(B * S_pad * 2 * 4
                           + B * (S_pad // st) * L_pad * D * 2 * 2
                           + B * S_pad * D * h.dtype.itemsize + w2_bytes))

    out = pl.pallas_call(
        _span_out_kernel,
        out_shape=jax.ShapeDtypeStruct((B, S_pad, D), h.dtype),
        grid_spec=pltpu.PrefetchScalarGridSpec(
            num_scalar_prefetch=0,
            grid=(B, S_pad // st, L_pad // lc),
            in_specs=[pl.BlockSpec((1, st, 2), lambda b, s, l: (b, s, 0)),
                      pl.BlockSpec((1, lc, D), lambda b, s, l: (b, l, 0)),
                      pl.BlockSpec((1, lc, D), lambda b, s, l: (b, l, 0)),
                      _wspec(wo1a), _wspec(wo1b), _wspec(bo1f),
                      _wspec(wo2b), _wspec(bo2f)],
            out_specs=pl.BlockSpec((1, st, D), lambda b, s, l: (b, s, 0)),
            scratch_shapes=[pltpu.VMEM((st, D), jnp.float32),
                            pltpu.VMEM((st, D), jnp.float32)]),
        compiler_params=cparams2,
        cost_estimate=ce2,
    )(idx_p, srep, erep, wo1a, wo1b, bo1f, wo2b, bo2f)

    out = out if S_pad == S else out[:, :S, :]
    return out.reshape(B, L, max_width, D)


def reference(h, span_idx, params, max_width):
    """Pure-JAX f32 reference mirroring the PyTorch forward (eval mode)."""
    (ws1, bs1, ws2, bs2, we1, be1, we2, be2, wo1, bo1, wo2, bo2) = params
    B, L, D = h.shape
    S = span_idx.shape[1]

    def proj(x, w1, b1, w2, b2):
        return jnp.maximum(x @ w1 + b1, 0.0) @ w2 + b2

    start_rep = proj(h, ws1, bs1, ws2, bs2)
    end_rep = proj(h, we1, be1, we2, be2)

    def gather(seq, idx):
        idx_e = jnp.broadcast_to(idx[:, :, None], (B, S, D)).astype(jnp.int32)
        return jnp.take_along_axis(seq, idx_e, axis=1)

    start_span = gather(start_rep, span_idx[:, :, 0])
    end_span = gather(end_rep, span_idx[:, :, 1])
    cat = jnp.maximum(jnp.concatenate([start_span, end_span], axis=-1), 0.0)
    out = proj(cat, wo1, bo1, wo2, bo2)
    return out.reshape(B, L, max_width, D)


if __name__ == "__main__":
    B, L, D, MAX_WIDTH = 2, 8, 32, 4
    key = jax.random.PRNGKey(0)
    kh, kp = jax.random.split(key, 2)

    h = jax.random.normal(kh, (B, L, D), jnp.float32)

    # Standard GLiNER-style span index table: for each start position i and
    # width w, the span is (i, min(i + w, L - 1)).
    starts = jnp.repeat(jnp.arange(L, dtype=jnp.int32), MAX_WIDTH)
    widths = jnp.tile(jnp.arange(MAX_WIDTH, dtype=jnp.int32), L)
    ends = jnp.minimum(starts + widths, L - 1)
    span_idx = jnp.broadcast_to(jnp.stack([starts, ends], axis=-1)[None],
                                (B, L * MAX_WIDTH, 2)).astype(jnp.int32)

    params = init_params(kp, D)

    # TODO(synk): nn.Dropout(0.4) has no inference-time effect; treated as identity.
    fwd = jax.jit(lambda hh, ii: span_rep_layer(hh, ii, params, MAX_WIDTH))
    out = jax.block_until_ready(fwd(h, span_idx))

    ref = reference(h, span_idx, params, MAX_WIDTH)
    assert out.shape == (B, L, MAX_WIDTH, D)
    # bf16 MXU operands + bf16 inter-stage reps (f32 accumulation) -> compare
    # against the f32 reference with bf16-appropriate tolerance.
    assert jnp.allclose(out, ref, atol=2e-2, rtol=2e-2), float(
        jnp.max(jnp.abs(out - ref)))
    print("KERNEL_OK")
</pallas_src>

<mosaic_0001>
module attributes {stable_mosaic.version = 11 : i64} {
  func.func @_project_kernel(%arg0: i32, %arg1: i32, %arg2: memref<1x8x32xf32, #tpu.memory_space<vmem>>, %arg3: memref<32x128xbf16, #tpu.memory_space<vmem>>, %arg4: memref<1x128xf32, #tpu.memory_space<vmem>>, %arg5: memref<128x32xbf16, #tpu.memory_space<vmem>>, %arg6: memref<1x32xf32, #tpu.memory_space<vmem>>, %arg7: memref<32x128xbf16, #tpu.memory_space<vmem>>, %arg8: memref<1x128xf32, #tpu.memory_space<vmem>>, %arg9: memref<128x32xbf16, #tpu.memory_space<vmem>>, %arg10: memref<1x32xf32, #tpu.memory_space<vmem>>, %arg11: memref<1x8x32xbf16, #tpu.memory_space<vmem>>, %arg12: memref<1x8x32xbf16, #tpu.memory_space<vmem>>) attributes {dimension_semantics = [#tpu.dimension_semantics<parallel>, #tpu.dimension_semantics<parallel>], iteration_bounds = array<i64: 2, 1>, scalar_prefetch = 0 : i64, scratch_operands = 0 : i64, tpu.core_type = #tpu.core_type<tc>, window_params = [{transform_indices = @transform_0, window_bounds = array<i64: 1, 8, 32>}, {pipeline_mode = #tpu.pipeline_mode<synchronous>, transform_indices = @transform_1, window_bounds = array<i64: 32, 128>}, {pipeline_mode = #tpu.pipeline_mode<synchronous>, transform_indices = @transform_2, window_bounds = array<i64: 1, 128>}, {pipeline_mode = #tpu.pipeline_mode<synchronous>, transform_indices = @transform_3, window_bounds = array<i64: 128, 32>}, {pipeline_mode = #tpu.pipeline_mode<synchronous>, transform_indices = @transform_4, window_bounds = array<i64: 1, 32>}, {pipeline_mode = #tpu.pipeline_mode<synchronous>, transform_indices = @transform_5, window_bounds = array<i64: 32, 128>}, {pipeline_mode = #tpu.pipeline_mode<synchronous>, transform_indices = @transform_6, window_bounds = array<i64: 1, 128>}, {pipeline_mode = #tpu.pipeline_mode<synchronous>, transform_indices = @transform_7, window_bounds = array<i64: 128, 32>}, {pipeline_mode = #tpu.pipeline_mode<synchronous>, transform_indices = @transform_8, window_bounds = array<i64: 1, 32>}, {transform_indices = @transform_9, window_bounds = array<i64: 1, 8, 32>}, {transform_indices = @transform_10, window_bounds = array<i64: 1, 8, 32>}]} {
    %c0 = arith.constant 0 : index
    %c0_0 = arith.constant 0 : index
    %c0_1 = arith.constant 0 : index
    %0 = vector.load %arg2[%c0, %c0_0, %c0_1] : memref<1x8x32xf32, #tpu.memory_space<vmem>>, vector<1x8x32xf32>
    %1 = vector.shape_cast %0 : vector<1x8x32xf32> to vector<8x32xf32>
    %2 = arith.truncf %1 : vector<8x32xf32> to vector<8x32xbf16>
    %c0_2 = arith.constant 0 : index
    %c0_3 = arith.constant 0 : index
    %3 = vector.load %arg3[%c0_2, %c0_3] : memref<32x128xbf16, #tpu.memory_space<vmem>>, vector<32x128xbf16>
    %cst = arith.constant dense<0.000000e+00> : vector<8x128xf32>
    %4 = tpu.matmul %2, %3, %cst {dimension_numbers = #tpu.dot_dimension_numbers<[1], [0], [0], [1], [0, 0, 1, 1], [], []>} : vector<8x32xbf16>, vector<32x128xbf16>, vector<8x128xf32> -> vector<8x128xf32>
    %c0_4 = arith.constant 0 : index
    %c0_5 = arith.constant 0 : index
    %5 = vector.load %arg4[%c0_4, %c0_5] : memref<1x128xf32, #tpu.memory_space<vmem>>, vector<1x128xf32>
    %6 = vector.broadcast %5 : vector<1x128xf32> to vector<8x128xf32>
    %7 = arith.addf %4, %6 : vector<8x128xf32>
    %cst_6 = arith.constant 0.000000e+00 : f32
    %8 = vector.broadcast %cst_6 : f32 to vector<8x128xf32>
    %9 = arith.maximumf %7, %8 : vector<8x128xf32>
    %10 = arith.truncf %9 : vector<8x128xf32> to vector<8x128xbf16>
    %c0_7 = arith.constant 0 : index
    %c0_8 = arith.constant 0 : index
    %11 = vector.load %arg5[%c0_7, %c0_8] : memref<128x32xbf16, #tpu.memory_space<vmem>>, vector<128x32xbf16>
    %cst_9 = arith.constant dense<0.000000e+00> : vector<8x32xf32>
    %12 = tpu.matmul %10, %11, %cst_9 {dimension_numbers = #tpu.dot_dimension_numbers<[1], [0], [0], [1], [0, 0, 1, 1], [], []>} : vector<8x128xbf16>, vector<128x32xbf16>, vector<8x32xf32> -> vector<8x32xf32>
    %c0_10 = arith.constant 0 : index
    %c0_11 = arith.constant 0 : index
    %13 = vector.load %arg6[%c0_10, %c0_11] : memref<1x32xf32, #tpu.memory_space<vmem>>, vector<1x32xf32>
    %14 = vector.broadcast %13 : vector<1x32xf32> to vector<8x32xf32>
    %15 = arith.addf %12, %14 : vector<8x32xf32>
    %16 = arith.truncf %15 : vector<8x32xf32> to vector<8x32xbf16>
    %c0_12 = arith.constant 0 : index
    %c0_13 = arith.constant 0 : index
    %c0_14 = arith.constant 0 : index
    %17 = vector.load %arg11[%c0_12, %c0_13, %c0_14] : memref<1x8x32xbf16, #tpu.memory_space<vmem>>, vector<1x8x32xbf16>
    %18 = vector.shape_cast %17 : vector<1x8x32xbf16> to vector<8x32xbf16>
    %19 = vector.shape_cast %16 : vector<8x32xbf16> to vector<1x8x32xbf16>
    tpu.vector_store %arg11[%c0_12, %c0_13, %c0_14], %19 {strides = array<i32>} : memref<1x8x32xbf16, #tpu.memory_space<vmem>>, vector<1x8x32xbf16>,
    %c0_15 = arith.constant 0 : index
    %c0_16 = arith.constant 0 : index
    %20 = vector.load %arg7[%c0_15, %c0_16] : memref<32x128xbf16, #tpu.memory_space<vmem>>, vector<32x128xbf16>
    %cst_17 = arith.constant dense<0.000000e+00> : vector<8x128xf32>
    %21 = tpu.matmul %2, %20, %cst_17 {dimension_numbers = #tpu.dot_dimension_numbers<[1], [0], [0], [1], [0, 0, 1, 1], [], []>} : vector<8x32xbf16>, vector<32x128xbf16>, vector<8x128xf32> -> vector<8x128xf32>
    %c0_18 = arith.constant 0 : index
    %c0_19 = arith.constant 0 : index
    %22 = vector.load %arg8[%c0_18, %c0_19] : memref<1x128xf32, #tpu.memory_space<vmem>>, vector<1x128xf32>
    %23 = vector.broadcast %22 : vector<1x128xf32> to vector<8x128xf32>
    %24 = arith.addf %21, %23 : vector<8x128xf32>
    %cst_20 = arith.constant 0.000000e+00 : f32
    %25 = vector.broadcast %cst_20 : f32 to vector<8x128xf32>
    %26 = arith.maximumf %24, %25 : vector<8x128xf32>
    %27 = arith.truncf %26 : vector<8x128xf32> to vector<8x128xbf16>
    %c0_21 = arith.constant 0 : index
    %c0_22 = arith.constant 0 : index
    %28 = vector.load %arg9[%c0_21, %c0_22] : memref<128x32xbf16, #tpu.memory_space<vmem>>, vector<128x32xbf16>
    %cst_23 = arith.constant dense<0.000000e+00> : vector<8x32xf32>
    %29 = tpu.matmul %27, %28, %cst_23 {dimension_numbers = #tpu.dot_dimension_numbers<[1], [0], [0], [1], [0, 0, 1, 1], [], []>} : vector<8x128xbf16>, vector<128x32xbf16>, vector<8x32xf32> -> vector<8x32xf32>
    %c0_24 = arith.constant 0 : index
    %c0_25 = arith.constant 0 : index
    %30 = vector.load %arg10[%c0_24, %c0_25] : memref<1x32xf32, #tpu.memory_space<vmem>>, vector<1x32xf32>
    %31 = vector.broadcast %30 : vector<1x32xf32> to vector<8x32xf32>
    %32 = arith.addf %29, %31 : vector<8x32xf32>
    %33 = arith.truncf %32 : vector<8x32xf32> to vector<8x32xbf16>
    %c0_26 = arith.constant 0 : index
    %c0_27 = arith.constant 0 : index
    %c0_28 = arith.constant 0 : index
    %34 = vector.load %arg12[%c0_26, %c0_27, %c0_28] : memref<1x8x32xbf16, #tpu.memory_space<vmem>>, vector<1x8x32xbf16>
    %35 = vector.shape_cast %34 : vector<1x8x32xbf16> to vector<8x32xbf16>
    %36 = vector.shape_cast %33 : vector<8x32xbf16> to vector<1x8x32xbf16>
    tpu.vector_store %arg12[%c0_26, %c0_27, %c0_28], %36 {strides = array<i32>} : memref<1x8x32xbf16, #tpu.memory_space<vmem>>, vector<1x8x32xbf16>,
    return
  }
  func.func @transform_0(%arg0: i32, %arg1: i32) -> (i32, i32, i32) {
    %c0_i32 = arith.constant 0 : i32
    %c0_i32_0 = arith.constant 0 : i32
    return %arg0, %arg1, %c0_i32 : i32, i32, i32
  }
  func.func @transform_1(%arg0: i32, %arg1: i32) -> (i32, i32) {
    %c0_i32 = arith.constant 0 : i32
    %c0_i32_0 = arith.constant 0 : i32
    %c0_i32_1 = arith.constant 0 : i32
    return %c0_i32, %c0_i32_0 : i32, i32
  }
  func.func @transform_2(%arg0: i32, %arg1: i32) -> (i32, i32) {
    %c0_i32 = arith.constant 0 : i32
    %c0_i32_0 = arith.constant 0 : i32
    %c0_i32_1 = arith.constant 0 : i32
    return %c0_i32, %c0_i32_0 : i32, i32
  }
  func.func @transform_3(%arg0: i32, %arg1: i32) -> (i32, i32) {
    %c0_i32 = arith.constant 0 : i32
    %c0_i32_0 = arith.constant 0 : i32
    %c0_i32_1 = arith.constant 0 : i32
    return %c0_i32, %c0_i32_0 : i32, i32
  }
  func.func @transform_4(%arg0: i32, %arg1: i32) -> (i32, i32) {
    %c0_i32 = arith.constant 0 : i32
    %c0_i32_0 = arith.constant 0 : i32
    %c0_i32_1 = arith.constant 0 : i32
    return %c0_i32, %c0_i32_0 : i32, i32
  }
  func.func @transform_5(%arg0: i32, %arg1: i32) -> (i32, i32) {
    %c0_i32 = arith.constant 0 : i32
    %c0_i32_0 = arith.constant 0 : i32
    %c0_i32_1 = arith.constant 0 : i32
    return %c0_i32, %c0_i32_0 : i32, i32
  }
  func.func @transform_6(%arg0: i32, %arg1: i32) -> (i32, i32) {
    %c0_i32 = arith.constant 0 : i32
    %c0_i32_0 = arith.constant 0 : i32
    %c0_i32_1 = arith.constant 0 : i32
    return %c0_i32, %c0_i32_0 : i32, i32
  }
  func.func @transform_7(%arg0: i32, %arg1: i32) -> (i32, i32) {
    %c0_i32 = arith.constant 0 : i32
    %c0_i32_0 = arith.constant 0 : i32
    %c0_i32_1 = arith.constant 0 : i32
    return %c0_i32, %c0_i32_0 : i32, i32
  }
  func.func @transform_8(%arg0: i32, %arg1: i32) -> (i32, i32) {
    %c0_i32 = arith.constant 0 : i32
    %c0_i32_0 = arith.constant 0 : i32
    %c0_i32_1 = arith.constant 0 : i32
    return %c0_i32, %c0_i32_0 : i32, i32
  }
  func.func @transform_9(%arg0: i32, %arg1: i32) -> (i32, i32, i32) {
    %c0_i32 = arith.constant 0 : i32
    %c0_i32_0 = arith.constant 0 : i32
    return %arg0, %arg1, %c0_i32 : i32, i32, i32
  }
  func.func @transform_10(%arg0: i32, %arg1: i32) -> (i32, i32, i32) {
    %c0_i32 = arith.constant 0 : i32
    %c0_i32_0 = arith.constant 0 : i32
    return %arg0, %arg1, %c0_i32 : i32, i32, i32
  }
}

module attributes {stable_mosaic.version = 11 : i64} {
  func.func @_span_out_kernel(%arg0: i32, %arg1: i32, %arg2: i32, %arg3: memref<1x32x2xi32, #tpu.memory_space<vmem>>, %arg4: memref<1x8x32xbf16, #tpu.memory_space<vmem>>, %arg5: memref<1x8x32xbf16, #tpu.memory_space<vmem>>, %arg6: memref<32x128xbf16, #tpu.memory_space<vmem>>, %arg7: memref<32x128xbf16, #tpu.memory_space<vmem>>, %arg8: memref<1x128xf32, #tpu.memory_space<vmem>>, %arg9: memref<128x32xbf16, #tpu.memory_space<vmem>>, %arg10: memref<1x32xf32, #tpu.memory_space<vmem>>, %arg11: memref<1x32x32xf32, #tpu.memory_space<vmem>>, %arg12: memref<32x32xf32, #tpu.memory_space<vmem>>, %arg13: memref<32x32xf32, #tpu.memory_space<vmem>>) attributes {dimension_semantics = [#tpu.dimension_semantics<parallel>, #tpu.dimension_semantics<parallel>, #tpu.dimension_semantics<arbitrary>], iteration_bounds = array<i64: 2, 1, 1>, scalar_prefetch = 0 : i64, scratch_operands = 2 : i64, tpu.core_type = #tpu.core_type<tc>, window_params = [{transform_indices = @transform_0, window_bounds = array<i64: 1, 32, 2>}, {transform_indices = @transform_1, window_bounds = array<i64: 1, 8, 32>}, {transform_indices = @transform_2, window_bounds = array<i64: 1, 8, 32>}, {pipeline_mode = #tpu.pipeline_mode<synchronous>, transform_indices = @transform_3, window_bounds = array<i64: 32, 128>}, {pipeline_mode = #tpu.pipeline_mode<synchronous>, transform_indices = @transform_4, window_bounds = array<i64: 32, 128>}, {pipeline_mode = #tpu.pipeline_mode<synchronous>, transform_indices = @transform_5, window_bounds = array<i64: 1, 128>}, {pipeline_mode = #tpu.pipeline_mode<synchronous>, transform_indices = @transform_6, window_bounds = array<i64: 128, 32>}, {pipeline_mode = #tpu.pipeline_mode<synchronous>, transform_indices = @transform_7, window_bounds = array<i64: 1, 32>}, {transform_indices = @transform_8, window_bounds = array<i64: 1, 32, 32>}]} {
    %c0_i32 = arith.constant 0 : i32
    %0 = arith.cmpi eq, %arg2, %c0_i32 : i32
    %1 = arith.extui %0 : i1 to i32
    %c0_i32_0 = arith.constant 0 : i32
    %2 = arith.cmpi ne, %1, %c0_i32_0 : i32
    scf.if %2 {
      %cst_20 = arith.constant 0.000000e+00 : f32
      %36 = vector.broadcast %cst_20 : f32 to vector<32x32xf32>
      %c0_21 = arith.constant 0 : index
      %c0_22 = arith.constant 0 : index
      %37 = vector.load %arg12[%c0_21, %c0_22] : memref<32x32xf32, #tpu.memory_space<vmem>>, vector<32x32xf32>
      tpu.vector_store %arg12[%c0_21, %c0_22], %36 {strides = array<i32>} : memref<32x32xf32, #tpu.memory_space<vmem>>, vector<32x32xf32>,
      %cst_23 = arith.constant 0.000000e+00 : f32
      %38 = vector.broadcast %cst_23 : f32 to vector<32x32xf32>
      %c0_24 = arith.constant 0 : index
      %c0_25 = arith.constant 0 : index
      %39 = vector.load %arg13[%c0_24, %c0_25] : memref<32x32xf32, #tpu.memory_space<vmem>>, vector<32x32xf32>
      tpu.vector_store %arg13[%c0_24, %c0_25], %38 {strides = array<i32>} : memref<32x32xf32, #tpu.memory_space<vmem>>, vector<32x32xf32>,
    } else {
    }
    %c0 = arith.constant 0 : index
    %c0_1 = arith.constant 0 : index
    %c0_2 = arith.constant 0 : index
    %3 = vector.load %arg4[%c0, %c0_1, %c0_2] : memref<1x8x32xbf16, #tpu.memory_space<vmem>>, vector<1x8x32xbf16>
    %4 = vector.shape_cast %3 : vector<1x8x32xbf16> to vector<8x32xbf16>
    %c0_3 = arith.constant 0 : index
    %c0_4 = arith.constant 0 : index
    %c0_5 = arith.constant 0 : index
    %5 = vector.load %arg5[%c0_3, %c0_4, %c0_5] : memref<1x8x32xbf16, #tpu.memory_space<vmem>>, vector<1x8x32xbf16>
    %6 = vector.shape_cast %5 : vector<1x8x32xbf16> to vector<8x32xbf16>
    %c0_6 = arith.constant 0 : index
    %c0_7 = arith.constant 0 : index
    %c0_8 = arith.constant 0 : index
    %7 = vector.load %arg3[%c0_6, %c0_7, %c0_8] : memref<1x32x2xi32, #tpu.memory_space<vmem>>, vector<1x32x2xi32>
    %8 = vector.shape_cast %7 : vector<1x32x2xi32> to vector<32x2xi32>
    %c8_i32 = arith.constant 8 : i32
    %9 = arith.muli %arg2, %c8_i32 : i32
    %10 = tpu.iota {dimensions = array<i32: 1>} : vector<32x8xi32>
    %11 = vector.broadcast %9 : i32 to vector<32x8xi32>
    %12 = arith.addi %10, %11 : vector<32x8xi32>
    %13 = vector.extract_strided_slice %8 {offsets = [0, 0], sizes = [32, 1], strides = [1, 1]} : vector<32x2xi32> to vector<32x1xi32>
    %14 = vector.broadcast %13 : vector<32x1xi32> to vector<32x8xi32>
    %15 = arith.cmpi eq, %12, %14 : vector<32x8xi32>
    %16 = arith.extui %15 : vector<32x8xi1> to vector<32x8xi32>
    %17 = arith.sitofp %16 : vector<32x8xi32> to vector<32x8xf32>
    %18 = arith.truncf %17 : vector<32x8xf32> to vector<32x8xbf16>
    %19 = vector.extract_strided_slice %8 {offsets = [0, 1], sizes = [32, 1], strides = [1, 1]} : vector<32x2xi32> to vector<32x1xi32>
    %20 = vector.broadcast %19 : vector<32x1xi32> to vector<32x8xi32>
    %21 = arith.cmpi eq, %12, %20 : vector<32x8xi32>
    %22 = arith.extui %21 : vector<32x8xi1> to vector<32x8xi32>
    %23 = arith.sitofp %22 : vector<32x8xi32> to vector<32x8xf32>
    %24 = arith.truncf %23 : vector<32x8xf32> to vector<32x8xbf16>
    %c0_9 = arith.constant 0 : index
    %c0_10 = arith.constant 0 : index
    %25 = vector.load %arg12[%c0_9, %c0_10] : memref<32x32xf32, #tpu.memory_space<vmem>>, vector<32x32xf32>
    %cst = arith.constant dense<0.000000e+00> : vector<32x32xf32>
    %26 = tpu.matmul %18, %4, %cst {dimension_numbers = #tpu.dot_dimension_numbers<[1], [0], [0], [1], [0, 0, 1, 1], [], []>} : vector<32x8xbf16>, vector<8x32xbf16>, vector<32x32xf32> -> vector<32x32xf32>
    %27 = arith.addf %25, %26 : vector<32x32xf32>
    %c0_11 = arith.constant 0 : index
    %c0_12 = arith.constant 0 : index
    %28 = vector.load %arg12[%c0_11, %c0_12] : memref<32x32xf32, #tpu.memory_space<vmem>>, vector<32x32xf32>
    tpu.vector_store %arg12[%c0_11, %c0_12], %27 {strides = array<i32>} : memref<32x32xf32, #tpu.memory_space<vmem>>, vector<32x32xf32>,
    %c0_13 = arith.constant 0 : index
    %c0_14 = arith.constant 0 : index
    %29 = vector.load %arg13[%c0_13, %c0_14] : memref<32x32xf32, #tpu.memory_space<vmem>>, vector<32x32xf32>
    %cst_15 = arith.constant dense<0.000000e+00> : vector<32x32xf32>
    %30 = tpu.matmul %24, %6, %cst_15 {dimension_numbers = #tpu.dot_dimension_numbers<[1], [0], [0], [1], [0, 0, 1, 1], [], []>} : vector<32x8xbf16>, vector<8x32xbf16>, vector<32x32xf32> -> vector<32x32xf32>
    %31 = arith.addf %29, %30 : vector<32x32xf32>
    %c0_16 = arith.constant 0 : index
    %c0_17 = arith.constant 0 : index
    %32 = vector.load %arg13[%c0_16, %c0_17] : memref<32x32xf32, #tpu.memory_space<vmem>>, vector<32x32xf32>
    tpu.vector_store %arg13[%c0_16, %c0_17], %31 {strides = array<i32>} : memref<32x32xf32, #tpu.memory_space<vmem>>, vector<32x32xf32>,
    %c0_i32_18 = arith.constant 0 : i32
    %33 = arith.cmpi eq, %arg2, %c0_i32_18 : i32
    %34 = arith.extui %33 : i1 to i32
    %c0_i32_19 = arith.constant 0 : i32
    %35 = arith.cmpi ne, %34, %c0_i32_19 : i32
    scf.if %35 {
      %c0_20 = arith.constant 0 : index
      %c0_21 = arith.constant 0 : index
      %36 = vector.load %arg12[%c0_20, %c0_21] : memref<32x32xf32, #tpu.memory_space<vmem>>, vector<32x32xf32>
      %cst_22 = arith.constant 0.000000e+00 : f32
      %37 = vector.broadcast %cst_22 : f32 to vector<32x32xf32>
      %38 = arith.maximumf %36, %37 : vector<32x32xf32>
      %39 = arith.truncf %38 : vector<32x32xf32> to vector<32x32xbf16>
      %c0_23 = arith.constant 0 : index
      %c0_24 = arith.constant 0 : index
      %40 = vector.load %arg13[%c0_23, %c0_24] : memref<32x32xf32, #tpu.memory_space<vmem>>, vector<32x32xf32>
      %cst_25 = arith.constant 0.000000e+00 : f32
      %41 = vector.broadcast %cst_25 : f32 to vector<32x32xf32>
      %42 = arith.maximumf %40, %41 : vector<32x32xf32>
      %43 = arith.truncf %42 : vector<32x32xf32> to vector<32x32xbf16>
      %c0_26 = arith.constant 0 : index
      %c0_27 = arith.constant 0 : index
      %44 = vector.load %arg6[%c0_26, %c0_27] : memref<32x128xbf16, #tpu.memory_space<vmem>>, vector<32x128xbf16>
      %cst_28 = arith.constant dense<0.000000e+00> : vector<32x128xf32>
      %45 = tpu.matmul %39, %44, %cst_28 {dimension_numbers = #tpu.dot_dimension_numbers<[1], [0], [0], [1], [0, 0, 1, 1], [], []>} : vector<32x32xbf16>, vector<32x128xbf16>, vector<32x128xf32> -> vector<32x128xf32>
      %c0_29 = arith.constant 0 : index
      %c0_30 = arith.constant 0 : index
      %46 = vector.load %arg7[%c0_29, %c0_30] : memref<32x128xbf16, #tpu.memory_space<vmem>>, vector<32x128xbf16>
      %cst_31 = arith.constant dense<0.000000e+00> : vector<32x128xf32>
      %47 = tpu.matmul %43, %46, %cst_31 {dimension_numbers = #tpu.dot_dimension_numbers<[1], [0], [0], [1], [0, 0, 1, 1], [], []>} : vector<32x32xbf16>, vector<32x128xbf16>, vector<32x128xf32> -> vector<32x128xf32>
      %48 = arith.addf %45, %47 : vector<32x128xf32>
      %c0_32 = arith.constant 0 : index
      %c0_33 = arith.constant 0 : index
      %49 = vector.load %arg8[%c0_32, %c0_33] : memref<1x128xf32, #tpu.memory_space<vmem>>, vector<1x128xf32>
      %50 = vector.broadcast %49 : vector<1x128xf32> to vector<32x128xf32>
      %51 = arith.addf %48, %50 : vector<32x128xf32>
      %cst_34 = arith.constant 0.000000e+00 : f32
      %52 = vector.broadcast %cst_34 : f32 to vector<32x128xf32>
      %53 = arith.maximumf %51, %52 : vector<32x128xf32>
      %54 = arith.truncf %53 : vector<32x128xf32> to vector<32x128xbf16>
      %c0_35 = arith.constant 0 : index
      %c0_36 = arith.constant 0 : index
      %55 = vector.load %arg9[%c0_35, %c0_36] : memref<128x32xbf16, #tpu.memory_space<vmem>>, vector<128x32xbf16>
      %cst_37 = arith.constant dense<0.000000e+00> : vector<32x32xf32>
      %56 = tpu.matmul %54, %55, %cst_37 {dimension_numbers = #tpu.dot_dimension_numbers<[1], [0], [0], [1], [0, 0, 1, 1], [], []>} : vector<32x128xbf16>, vector<128x32xbf16>, vector<32x32xf32> -> vector<32x32xf32>
      %c0_38 = arith.constant 0 : index
      %c0_39 = arith.constant 0 : index
      %57 = vector.load %arg10[%c0_38, %c0_39] : memref<1x32xf32, #tpu.memory_space<vmem>>, vector<1x32xf32>
      %58 = vector.broadcast %57 : vector<1x32xf32> to vector<32x32xf32>
      %59 = arith.addf %56, %58 : vector<32x32xf32>
      %c0_40 = arith.constant 0 : index
      %c0_41 = arith.constant 0 : index
      %c0_42 = arith.constant 0 : index
      %60 = vector.load %arg11[%c0_40, %c0_41, %c0_42] : memref<1x32x32xf32, #tpu.memory_space<vmem>>, vector<1x32x32xf32>
      %61 = vector.shape_cast %60 : vector<1x32x32xf32> to vector<32x32xf32>
      %62 = vector.shape_cast %59 : vector<32x32xf32> to vector<1x32x32xf32>
      tpu.vector_store %arg11[%c0_40, %c0_41, %c0_42], %62 {strides = array<i32>} : memref<1x32x32xf32, #tpu.memory_space<vmem>>, vector<1x32x32xf32>,
    } else {
    }
    return
  }
  func.func @transform_0(%arg0: i32, %arg1: i32, %arg2: i32) -> (i32, i32, i32) {
    %c0_i32 = arith.constant 0 : i32
    %c0_i32_0 = arith.constant 0 : i32
    return %arg0, %arg1, %c0_i32 : i32, i32, i32
  }
  func.func @transform_1(%arg0: i32, %arg1: i32, %arg2: i32) -> (i32, i32, i32) {
    %c0_i32 = arith.constant 0 : i32
    %c0_i32_0 = arith.constant 0 : i32
    return %arg0, %arg2, %c0_i32 : i32, i32, i32
  }
  func.func @transform_2(%arg0: i32, %arg1: i32, %arg2: i32) -> (i32, i32, i32) {
    %c0_i32 = arith.constant 0 : i32
    %c0_i32_0 = arith.constant 0 : i32
    return %arg0, %arg2, %c0_i32 : i32, i32, i32
  }
  func.func @transform_3(%arg0: i32, %arg1: i32, %arg2: i32) -> (i32, i32) {
    %c0_i32 = arith.constant 0 : i32
    %c0_i32_0 = arith.constant 0 : i32
    %c0_i32_1 = arith.constant 0 : i32
    return %c0_i32, %c0_i32_0 : i32, i32
  }
  func.func @transform_4(%arg0: i32, %arg1: i32, %arg2: i32) -> (i32, i32) {
    %c0_i32 = arith.constant 0 : i32
    %c0_i32_0 = arith.constant 0 : i32
    %c0_i32_1 = arith.constant 0 : i32
    return %c0_i32, %c0_i32_0 : i32, i32
  }
  func.func @transform_5(%arg0: i32, %arg1: i32, %arg2: i32) -> (i32, i32) {
    %c0_i32 = arith.constant 0 : i32
    %c0_i32_0 = arith.constant 0 : i32
    %c0_i32_1 = arith.constant 0 : i32
    return %c0_i32, %c0_i32_0 : i32, i32
  }
  func.func @transform_6(%arg0: i32, %arg1: i32, %arg2: i32) -> (i32, i32) {
    %c0_i32 = arith.constant 0 : i32
    %c0_i32_0 = arith.constant 0 : i32
    %c0_i32_1 = arith.constant 0 : i32
    return %c0_i32, %c0_i32_0 : i32, i32
  }
  func.func @transform_7(%arg0: i32, %arg1: i32, %arg2: i32) -> (i32, i32) {
    %c0_i32 = arith.constant 0 : i32
    %c0_i32_0 = arith.constant 0 : i32
    %c0_i32_1 = arith.constant 0 : i32
    return %c0_i32, %c0_i32_0 : i32, i32
  }
  func.func @transform_8(%arg0: i32, %arg1: i32, %arg2: i32) -> (i32, i32, i32) {
    %c0_i32 = arith.constant 0 : i32
    %c0_i32_0 = arith.constant 0 : i32
    return %arg0, %arg1, %c0_i32 : i32, i32, i32
  }
}

</mosaic_0001>

<bundles_post_ra>
// kernel: _lambda_.3
= control target key start
LH: loop header
LB: loop body
LE: loop exit
PB: predicated region body
PF: predicated region fallthrough
CT: control target
= control target key end

     0   :  { %13 = vsyncpa [#allocation5], 0  ;;  %s1368_s0 = inlined_call_operand.vmem [shape: s32[2,32,2], index: 0, kind: input, shape index: {}]   ;;  %s1369_s1 = inlined_call_operand.vmem [shape: bf16[2,8,32], index: 1, kind: input, shape index: {}]   ;;  %s1370_s2 = inlined_call_operand.vmem [shape: bf16[2,8,32], index: 2, kind: input, shape index: {}]   ;;  %s1371_s3 = inlined_call_operand.vmem [shape: bf16[32,128], index: 3, kind: input, shape index: {}]   ;;  %s1372_s4 = inlined_call_operand.vmem [shape: bf16[32,128], index: 4, kind: input, shape index: {}]   ;;  %s1373_s5 = inlined_call_operand.vmem [shape: f32[1,128], index: 5, kind: input, shape index: {}]   ;;  %s1374_s6 = inlined_call_operand.vmem [shape: bf16[128,32], index: 6, kind: input, shape index: {}]   ;;  %s1375_s7 = inlined_call_operand.vmem [shape: f32[1,32], index: 7, kind: input, shape index: {}]   ;;  %s1376_s8 = inlined_call_operand.hbm [shape: f32[2,32,32], index: 8, kind: output, shape index: {}]  }
   0x1   :  { %15 = vsyncpa [#allocation5 + $0x1], 0  ;;  %s1195_s27 = smov 0   ;;  %s1197_s28 = smov 0  }
   0x2   :  { %s1199_s29 = smov 0   ;;  %s1201_s30 = smov 0  }
   0x3   :  { %s1203_s9 = smov 0   ;;  %s1205_s10 = smov 0  }
   0x4 LB: > { %s898_s11 = sadd.s32 4294967295, %s1143_s10   ;;  %s899_s12 = sadd.s32 4294967294, %s1143_s10   ;;  %s1143_s10 = sphi %s1205_s10, %s21_s10   ;;  %s1139_s9 = sphi %s1203_s9, %s1383_s9   ;;  %s1135_s30 = sphi %s1201_s30, %s1382_s30   ;;  %s1131_s29 = sphi %s1199_s29, %s1381_s29   ;;  %s1127_s28 = sphi %s1197_s28, %s1380_s28   ;;  %s1123_s27 = sphi %s1195_s27, %s1379_s27  }
   0x5   : > { %s40_s13 = sadd.s32 1, %s1139_s9  ;;  %s238_s14 = sadd.s32 1, %s1131_s29 }
   0x6   : > { %p42_p0 = scmp.ge.s32.totalorder %s40_s13, 2  ;;  %p248_p1 = scmp.ne.s32.totalorder %s1131_s29, %s1127_s28 }
   0x7   : > { %p249_p2 = scmp.eq.s32.totalorder %s898_s11, 1  ;;  %p254_p3 = scmp.ne.s32.totalorder %s1127_s28, %s1123_s27 }
   0x8   : > { %s1385_s13 = smov (%p42_p0, %s40_s13), 0  ;;  %p255_p5 = scmp.eq.s32.totalorder %s899_s12, 1 }
   0x9   : > { %p1235_p4 = por %p249_p2, %p248_p1  ;;  %s233_s16 = ssub.s32 %s1139_s9, %s1385_s13 }
   0xa   : > { %p902_p6 = scmp.ge.s32.totalorder %s1143_s10, 1  ;;  %p236_p7 = scmp.eq.s32.totalorder %s233_s16, 0 }
   0xb   : > { %p1242_p8 = por %p255_p5, %p254_p3  ;;  %p321_p9 = scmp.lt.s32.totalorder %s1143_s10, 3 }
   0xc   : > { %s1248_s18 = scalar_select %p236_p7, %s1131_s29, %s238_s14  }
   0xd   : > { %p322_p10 = pnand %p902_p6, %p321_p9 }
   0xe   : > { %p374_p11 = scmp.lt.s32.totalorder (!%p322_p10), %s1135_s30, 1  ;;  %s370_s21 = sand.u32 (!%p322_p10), 1, %s1127_s28  }
   0xf   : > { %325 = sbr.rel (%p322_p10) target bundleno = 605 (0x25d), region = 52  ;;  %s903_s22 = sshll.u32 (!%p322_p10), %s370_s21, 5 }
  0x10   : > { %s372_s25 = scalar_lea.vmem (!%p322_p10), [#allocation4], %s903_s22  ;;  %s990_s26 = sshll.u32 (!%p322_p10), %s1135_s30, 5 }
  0x11   : > { %s782_s14 = scalar_lea.hbm (!%p322_p10), %s1376_s8, %s990_s26  ;;  %s1085_s26 = scalar_lea.hbm (!%p322_p10), %s1376_s8, 64 }
  0x14   : > { %v1145_v0 = vmov 1   ;;  %v1146_v1 = vmov 0   ;;  %s375_s19 = scalar_select %p374_p11, %s1135_s30, 1  ;;  %vm486_vm0 = vcmask 1043456   ;;  %vm403_vm1 = vcmask 261120   ;;  %v981_v33 = vld [vmem:[%s1372_s4 + $0x8] sm:$0xff] }
  0x15   : > { %1060 = vset.pattern.permute.xlu1 %v1145_v0  ;;  %1059 = vset.pattern.permute.xlu0 %v1146_v1  ;;  %v1147_v10 = vmov 0.0   ;;  %v419_v11 = vlaneseq  ;;  %vm479_vm6 = vcmask 64512   ;;  %v979_v34 = vld [vmem:[%s1371_s3 + $0x8] sm:$0xff]  ;;  %v980_v35 = vld [vmem:[%s1372_s4] sm:$0xff]  ;;  %v989_v47 = vld [vmem:[%s1374_s6 + $0x38] sm:$0xff] }
  0x16   : > { %1061 = vset.pattern.permute.xlu2 %v1146_v1  ;;  %s977_s20 = sshll.u32 %s375_s19, 5  ;;  %s906_s24 = sshll.u32 %s375_s19, 2  ;;  %404 = vst.msk [vmem:[#allocation2] sm:$0xff] %vm403_vm1, %v1147_v10  ;;  %613 = vmatpush.bf16.msra.mxu2 %v981_v33  ;;  %v978_v36 = vld [vmem:[%s1371_s3] sm:$0xff]  ;;  %v988_v50 = vld [vmem:[%s1374_s6 + $0x30] sm:$0xff]  ;;  %v987_v53 = vld [vmem:[%s1374_s6 + $0x28] sm:$0xff] }
  0x17   : > { %s381_s23 = scalar_lea.vmem %s1368_s0, %s977_s20  ;;  %s389_s11 = scalar_lea.vmem %s1369_s1, %s906_s24  ;;  %405 = vst.msk [vmem:[#allocation2 + $0x8] sm:$0xff] %vm403_vm1, %v1147_v10  ;;  %v420_v14 = vand.u32 127, %v419_v11  ;;  %650 = vmatpush.bf16.msra.mxu3 %v979_v34  ;;  %v986_v61 = vld [vmem:[%s1374_s6 + $0x20] sm:$0xff] }
  0x18   : > { %v414_v2 = vld [vmem:[%s381_s23] sm:$0xff]  ;;  %v416_v3 = vld [vmem:[%s381_s23 + $0x10] sm:$0xff]  ;;  %v415_v4 = vld [vmem:[%s381_s23 + $0x8] sm:$0xff]  ;;  %s396_s16 = scalar_lea.vmem %s1370_s2, %s906_s24  ;;  %406 = vst.msk [vmem:[#allocation2 + $0x10] sm:$0xff] %vm403_vm1, %v1147_v10  ;;  %s785_s19 = sshll.u32 %s782_s14, 4  ;;  %s786_s19 = int_to_ptr.hbm [resolvable:$true] %s785_s19 }
  0x19   : > { %450 = vperm.xlu1 %1060, %v414_v2   ;;  %424 = vperm.xlu0 %1059, %v414_v2   ;;  %v417_v5 = vld [vmem:[%s381_s23 + $0x18] sm:$0xff]  ;;  %v412_v6 = vld [vmem:[%s389_s11] sm:$0xf]  ;;  %407 = vst.msk [vmem:[#allocation2 + $0x18] sm:$0xff] %vm403_vm1, %v1147_v10  ;;  %s769_s20 = scalar_lea.sflag [#allocation5], %s370_s21  ;;  %s1079_s22 = sshra.s32 %s786_s19, 4  ;;  %s1080_s22 = int_to_ptr.hbm [resolvable:$true] %s1079_s22 }
  0x1a   : > { %430 = vperm.xlu2 %1061, %v416_v3   ;;  %v413_v7 = vld [vmem:[%s396_s16] sm:$0xf]  ;;  %v488_v8 = vsel %vm486_vm0, %v412_v6, 0  ;;  %408 = vst.msk [vmem:[#allocation3] sm:$0xff] %vm403_vm1, %v1147_v10  ;;  %614 = vmatpush.bf16.msra.mxu2 %v980_v35  ;;  %s783_s16 = sshll.u32 %s372_s25, 4  ;;  %s1081_s30 = scalar_lea.hbm %s1080_s22, 32  ;;  %s784_s16 = int_to_ptr.vmem [resolvable:$true] %s783_s16 }
  0x1b   : > { %v529_v9 = vsel %vm486_vm0, %v413_v7, 0  ;;  %497 = vmatpush.bf16.msra.mxu0 %v488_v8  ;;  %409 = vst.msk [vmem:[#allocation3 + $0x8] sm:$0xff] %vm403_vm1, %v1147_v10  ;;  %651 = vmatpush.bf16.msra.mxu3 %v978_v36  ;;  %p1082_p12 = scmp.ne.s32.totalorder %s1080_s22, %s1081_s30  ;;  %p1086_p1 = scmp.lt.s32.totalorder %s1080_s22, %s1376_s8 }
  0x1c   : > { %538 = vmatpush.bf16.msra.mxu1 %v529_v9  ;;  %410 = vst.msk [vmem:[#allocation3 + $0x10] sm:$0xff] %vm403_vm1, %v1147_v10  ;;  %p1087_p2 = scmp.lt.s32.totalorder %s1085_s26, %s1081_s30 }
  0x1d   : > { %411 = vst.msk [vmem:[#allocation3 + $0x18] sm:$0xff] %vm403_vm1, %v1147_v10  ;;  %v475_v37 = vld [vmem:[#allocation2] sm:$0xff]  ;;  %p1083_p13 = pnand %p1082_p12, %p1235_p4 }
  0x1e   : > { %v476_v43 = vld [vmem:[#allocation2 + $0x8] sm:$0xff]  ;;  %p1088_p3 = por %p1087_p2, %p1086_p1 }
  0x1f   : > { %745 = vmatpush.bf16.msrb.mxu0 %v989_v47  ;;  %v477_v51 = vld [vmem:[#allocation2 + $0x10] sm:$0xff]  ;;  %p1084_p0 = pneg %p1083_p13 }
  0x20   : > { %991 = vmatpush.bf16.msrb.mxu1 %v989_v47 }
  0x21   : > { %453 = vperm.xlu1 %1060, %v415_v4   ;;  %427 = vperm.xlu0 %1059, %v415_v4   ;;  %v518_v38 = vld [vmem:[#allocation3] sm:$0xff]  ;;  %p1089_p5 = pnand %p1088_p3, %p1084_p0 }
  0x22   : > { %433 = vperm.xlu2 %1061, %v417_v5   ;;  %v519_v44 = vld [vmem:[#allocation3 + $0x8] sm:$0xff] }
  0x23   : > { %v520_v52 = vld [vmem:[#allocation3 + $0x10] sm:$0xff]  ;;  %746 = vmatpush.bf16.msrb.mxu0 %v988_v50 }
  0x24   : > { %992 = vmatpush.bf16.msrb.mxu1 %v988_v50  ;;  %v521_v6 = vld [vmem:[#allocation3 + $0x18] sm:$0xff] }
  0x27   : > { %747 = vmatpush.bf16.msrb.mxu0 %v987_v53 }
  0x28   : > { %993 = vmatpush.bf16.msrb.mxu1 %v987_v53 }
  0x29   : > { %459 = vperm.xlu1 %1060, %v417_v5   ;;  %1062 = vset.pattern.permute.xlu0 %v1145_v0  ;;  %v478_v5 = vld [vmem:[#allocation2 + $0x18] sm:$0xff] }
  0x2a   : > { %456 = vperm.xlu0 %1062, %v416_v3  }
  0x2b   : > { %748 = vmatpush.bf16.msrb.mxu0 %v986_v61 }
  0x2c   : > { %994 = vmatpush.bf16.msrb.mxu1 %v986_v61 }
  0x74   : > { %v431_v15 = vpop.permute.xlu2 %430 }
  0x75   : > { %vm437_vm7 = vcmp.eq.s32.totalorder %v420_v14, %v431_v15 }
  0x76   : > { %v910_v27 = vsel %vm437_vm7, 1.0, %v1147_v10 }
  0x7c   : > { %v434_v24 = vpop.permute.xlu2 %433 }
  0x7d   : > { %vm438_vm8 = vcmp.eq.s32.totalorder %v420_v14, %v434_v24  ;;  %v982_v24 = vld [vmem:[%s1374_s6] sm:$0xff] }
  0x7e   : > { %v911_v28 = vsel %vm438_vm8, 1.0, %v1147_v10 }
  0x7f   : > { %v448_v31 = vpack.c.bf16 %v911_v28, %v910_v27  ;;  %v1063_v28 = vld [vmem:[%s1373_s5] ss:$0 sm:$0xff] }
  0x8b   : > { %v451_v12 = vpop.permute.xlu1 %450  ;;  %v425_v13 = vpop.permute.xlu0 %424 }
  0x8c   : > { %vm461_vm2 = vcmp.eq.s32.totalorder %v420_v14, %v451_v12  ;;  %vm435_vm3 = vcmp.eq.s32.totalorder %v420_v14, %v425_v13 }
  0x8d   : > { %v912_v18 = vsel %vm461_vm2, 1.0, %v1147_v10  ;;  %v908_v19 = vsel %vm435_vm3, 1.0, %v1147_v10 }
  0x93   : > { %v454_v16 = vpop.permute.xlu1 %453  ;;  %v428_v17 = vpop.permute.xlu0 %427 }
  0x94   : > { %vm462_vm4 = vcmp.eq.s32.totalorder %v420_v14, %v454_v16  ;;  %vm436_vm5 = vcmp.eq.s32.totalorder %v420_v14, %v428_v17 }
  0x95   : > { %v913_v20 = vsel %vm462_vm4, 1.0, %v1147_v10  ;;  %v909_v21 = vsel %vm436_vm5, 1.0, %v1147_v10 }
  0x96   : > { %v473_v22 = vpack.c.bf16 %v913_v20, %v912_v18  ;;  %v447_v23 = vpack.c.bf16 %v909_v21, %v908_v19  ;;  %v985_v21 = vld [vmem:[%s1374_s6 + $0x18] sm:$0xff] }
  0x97   : > { %749 = vmatpush.bf16.msrb.mxu0 %v985_v21  ;;  %995 = vmatpush.bf16.msrb.mxu1 %v985_v21 }
  0x98   : > { %916 = vmatmul.msk.bf16.vlgmr.msra.gmra.mxu0 %vm479_vm6, %v447_v23  ;;  %918 = vmatmul.msk.bf16.vlgmr.msra.gmra.mxu1 %vm479_vm6, %v473_v22  ;;  %v984_v22 = vld [vmem:[%s1374_s6 + $0x10] sm:$0xff]  ;;  %v983_v23 = vld [vmem:[%s1374_s6 + $0x8] sm:$0xff] }
  0x9b   : > { %v460_v25 = vpop.permute.xlu1 %459  ;;  %750 = vmatpush.bf16.msrb.mxu0 %v984_v22  ;;  %996 = vmatpush.bf16.msrb.mxu1 %v984_v22 }
  0x9c   : > { %v457_v26 = vpop.permute.xlu0 %456  ;;  %vm464_vm9 = vcmp.eq.s32.totalorder %v420_v14, %v460_v25 }
  0x9d   : > { %vm463_vm10 = vcmp.eq.s32.totalorder %v420_v14, %v457_v26  ;;  %v915_v29 = vsel %vm464_vm9, 1.0, %v1147_v10 }
  0x9e   : > { %v914_v30 = vsel %vm463_vm10, 1.0, %v1147_v10 }
  0x9f   : > { %v474_v32 = vpack.c.bf16 %v915_v29, %v914_v30  ;;  %751 = vmatpush.bf16.msrb.mxu0 %v983_v23  ;;  %997 = vmatpush.bf16.msrb.mxu1 %v983_v23 }
  0xa3   : > { %752 = vmatpush.bf16.msrb.mxu0 %v982_v24  ;;  %998 = vmatpush.bf16.msrb.mxu1 %v982_v24 }
  0xa8   : > { %917 = vmatmul.msk.bf16.gmra.mxu0 %vm479_vm6, %v448_v31  ;;  %919 = vmatmul.msk.bf16.gmra.mxu1 %vm479_vm6, %v474_v32 }
 0x115   : > { %v499_v39 = vpop.f32.mrf.mxu0  ;;  %v540_v40 = vpop.f32.mrf.mxu1 }
 0x116   : > { %v509_v41 = vadd.f32 %v499_v39, %v475_v37  ;;  %v550_v42 = vadd.f32 %v540_v40, %v518_v38 }
 0x118   : > { %514 = vst.msk [vmem:[#allocation2] sm:$0xff] %vm403_vm1, %v509_v41 }
 0x119   : > { %554 = vst.msk [vmem:[#allocation3] sm:$0xff] %vm403_vm1, %v550_v42 }
 0x11d   : > { %v501_v45 = vpop.f32.mrf.mxu0  ;;  %v542_v46 = vpop.f32.mrf.mxu1 }
 0x11e   : > { %v510_v48 = vadd.f32 %v501_v45, %v476_v43  ;;  %v551_v49 = vadd.f32 %v542_v46, %v519_v44 }
 0x11f   : > { %v561_v56 = vld [vmem:[#allocation2] sm:$0xff] }
 0x120   : > { %515 = vst.msk [vmem:[#allocation2 + $0x8] sm:$0xff] %vm403_vm1, %v510_v48  ;;  %v571_v59 = vld [vmem:[#allocation3] sm:$0xff]  ;;  %v565_v63 = vmax.f32 %v561_v56, 0.0 }
 0x121   : > { %555 = vst.msk [vmem:[#allocation3 + $0x8] sm:$0xff] %vm403_vm1, %v551_v49  ;;  %v575_v1 = vmax.f32 %v571_v59, 0.0  ;;  %v1064_v48 = vld [vmem:[%s1375_s7] ss:$0 sm:$0xff] }
 0x125   : > { %v504_v54 = vpop.f32.mrf.mxu0  ;;  %v545_v55 = vpop.f32.mrf.mxu1 }
 0x126   : > { %v511_v57 = vadd.f32 %v504_v54, %v477_v51  ;;  %v552_v58 = vadd.f32 %v545_v55, %v520_v52 }
 0x127   : > { %v562_v60 = vld [vmem:[#allocation2 + $0x8] sm:$0xff] }
 0x128   : > { %516 = vst.msk [vmem:[#allocation2 + $0x10] sm:$0xff] %vm403_vm1, %v511_v57  ;;  %v572_v62 = vld [vmem:[#allocation3 + $0x8] sm:$0xff]  ;;  %v566_v0 = vmax.f32 %v562_v60, 0.0 }
 0x129   : > { %556 = vst.msk [vmem:[#allocation3 + $0x10] sm:$0xff] %vm403_vm1, %v552_v58  ;;  %v576_v2 = vmax.f32 %v572_v62, 0.0 }
 0x12a   : > { %v569_v3 = vpack.c.bf16 %v566_v0, %v565_v63 }
 0x12b   : > { %v579_v4 = vpack.c.bf16 %v576_v2, %v575_v1 }
 0x12c   : > { %938 = vmatmul.msk.bf16.vlgmr.msra.gmra.mxu3 %vm403_vm1, %v569_v3 }
 0x12d   : > { %928 = vmatmul.msk.bf16.vlgmr.msra.gmra.mxu2 %vm403_vm1, %v579_v4  ;;  %v506_v7 = vpop.f32.mrf.mxu0  ;;  %v547_v8 = vpop.f32.mrf.mxu1 }
 0x12e   : > { %v512_v9 = vadd.f32 %v506_v7, %v478_v5  ;;  %v553_v10 = vadd.f32 %v547_v8, %v521_v6 }
 0x12f   : > { %v563_v11 = vld [vmem:[#allocation2 + $0x10] sm:$0xff] }
 0x130   : > { %517 = vst.msk [vmem:[#allocation2 + $0x18] sm:$0xff] %vm403_vm1, %v512_v9  ;;  %v573_v12 = vld [vmem:[#allocation3 + $0x10] sm:$0xff]  ;;  %v567_v15 = vmax.f32 %v563_v11, 0.0 }
 0x131   : > { %557 = vst.msk [vmem:[#allocation3 + $0x18] sm:$0xff] %vm403_vm1, %v553_v10  ;;  %v577_v17 = vmax.f32 %v573_v12, 0.0 }
 0x137   : > { %v564_v13 = vld [vmem:[#allocation2 + $0x18] sm:$0xff] }
 0x138   : > { %v574_v14 = vld [vmem:[#allocation3 + $0x18] sm:$0xff]  ;;  %v568_v16 = vmax.f32 %v564_v13, 0.0 }
 0x139   : > { %v578_v18 = vmax.f32 %v574_v14, 0.0 }
 0x13a   : > { %v570_v19 = vpack.c.bf16 %v568_v16, %v567_v15 }
 0x13b   : > { %v580_v20 = vpack.c.bf16 %v578_v18, %v577_v17 }
 0x13c   : > { %939 = vmatmul.msk.bf16.gmra.mxu3 %vm403_vm1, %v570_v19 }
 0x13d   : > { %929 = vmatmul.msk.bf16.gmra.mxu2 %vm403_vm1, %v580_v20 }
 0x1af   : > { %v653_v25 = vpop.f32.mrf.mxu3 }
 0x1b0   : > { %v616_v26 = vpop.f32.mrf.mxu2 }
 0x1b1   : > { %v654_v27 = vadd.f32 %v653_v25, %v616_v26 }
 0x1b3   : > { %v667_v31 = vadd.f32 %v1063_v28, %v654_v27 }
 0x1b5   : > { %v671_v34 = vmax.f32 %v667_v31, 0.0 }
 0x1b7   : > { %v655_v29 = vpop.f32.mrf.mxu3 }
 0x1b8   : > { %v618_v30 = vpop.f32.mrf.mxu2 }
 0x1b9   : > { %v656_v32 = vadd.f32 %v655_v29, %v618_v30 }
 0x1bb   : > { %v668_v33 = vadd.f32 %v1063_v28, %v656_v32 }
 0x1bd   : > { %v672_v35 = vmax.f32 %v668_v33, 0.0 }
 0x1bf   : > { %v658_v36 = vpop.f32.mrf.mxu3  ;;  %v675_v37 = vpack.c.bf16 %v672_v35, %v671_v34 }
 0x1c0   : > { %v621_v38 = vpop.f32.mrf.mxu2 }
 0x1c1   : > { %753 = vmatmul.bf16.vlgmr.msrb.gmra.mxu0 %v675_v37  ;;  %v659_v39 = vadd.f32 %v658_v36, %v621_v38 }
 0x1c3   : > { %v669_v42 = vadd.f32 %v1063_v28, %v659_v39 }
 0x1c5   : > { %v673_v45 = vmax.f32 %v669_v42, 0.0 }
 0x1c7   : > { %v660_v40 = vpop.f32.mrf.mxu3 }
 0x1c8   : > { %v623_v41 = vpop.f32.mrf.mxu2 }
 0x1c9   : > { %v661_v43 = vadd.f32 %v660_v40, %v623_v41 }
 0x1cb   : > { %v670_v44 = vadd.f32 %v1063_v28, %v661_v43 }
 0x1cd   : > { %v674_v46 = vmax.f32 %v670_v44, 0.0 }
 0x1cf   : > { %v676_v47 = vpack.c.bf16 %v674_v46, %v673_v45 }
 0x1d1   : > { %758 = vmatmul.bf16.vlgmr.msrb.gmra.mxu1 %v676_v47 }
 0x23e   : > { %v754_v49 = vpop.f32.mrf.mxu0 }
 0x23f   : > { %v755_v50 = vadd.f32 %v1064_v48, %v754_v49 }
 0x241   : > { %764 = vst.msk [vmem:[%s372_s25] sm:$0xff] %vm403_vm1, %v755_v50 }
 0x246   : > { %v756_v51 = vpop.f32.mrf.mxu0 }
 0x247   : > { %v757_v52 = vadd.f32 %v1064_v48, %v756_v51 }
 0x249   : > { %765 = vst.msk [vmem:[%s372_s25 + $0x8] sm:$0xff] %vm403_vm1, %v757_v52 }
 0x24e   : > { %v759_v53 = vpop.f32.mrf.mxu1 }
 0x24f   : > { %v760_v54 = vadd.f32 %v1064_v48, %v759_v53 }
 0x251   : > { %766 = vst.msk [vmem:[%s372_s25 + $0x10] sm:$0xff] %vm403_vm1, %v760_v54 }
 0x256   : > { %v761_v55 = vpop.f32.mrf.mxu1 }
 0x257   : > { %v762_v56 = vadd.f32 %v1064_v48, %v761_v55 }
 0x259   : > { %767 = vst.msk [vmem:[%s372_s25 + $0x18] sm:$0xff] %vm403_vm1, %v762_v56 }
 0x25a   : > { %1092 = shalt.err (!%p1089_p5)
}
 0x25b   : > { %s1148_s21 = smov 128   ;;  %s1149_s25 = smov 8  }
 0x25c   : > { %999 = dma.vmem_to_hbm [thread:$0]  (%p1235_p4), %s784_s16, 512, %s786_s19, %s769_s20, %s1148_s21, %s1148_s21, %s1149_s25  }
 0x25d PF: > { %p1005_p6 = scmp.ge.s32.totalorder %s1143_s10, 2  ;;  %s800_s14 = sand.u32 1, %s1123_s27  }
 0x25e   : > { %s801_s23 = scalar_lea.sflag [#allocation5], %s800_s14 }
 0x25f   : > { %p1002_p7 = pnand %p1005_p6, %p1242_p8 }
 0x261   : > { %p1003_p9 = pneg %p1002_p7 }
 0x263   : > { %1118 = dma.done.wait (%p1003_p9), %s801_s23, 512  }
 0x264   : > { %1120 = vsyncadd (%p1003_p9), %s801_s23, 4294966784  ;;  %s21_s10 = sadd.s32 1, %s1143_s10   ;;  %s1379_s27 = smov %s1127_s28 }
 0x265   : > { %p18_p10 = scmp.ge.s32.totalorder %s21_s10, 4   ;;  %s1380_s28 = smov %s1131_s29 }
 0x266   : > { %s1381_s29 = smov %s1248_s18  ;;  %s1382_s30 = smov %s1139_s9 }
 0x267   : > { %s1383_s9 = smov %s1385_s13  ;;  %20 = sbr.rel (!%p18_p10) target bundleno = 4 (0x4), region = 101 }
 0x26c   :  { %807 = vsyncpa [#allocation5], 1 }
 0x26d   :  { %809 = vsyncpa [#allocation5 + $0x1], 1 }

// kernel: _lambda_.2
= control target key start
LH: loop header
LB: loop body
LE: loop exit
PB: predicated region body
PF: predicated region fallthrough
CT: control target
= control target key end

     0   :  { %s1541_s0 = inlined_call_operand.hbm [shape: f32[2,8,32], index: 0, kind: input, shape index: {}]   ;;  %s1542_s1 = inlined_call_operand.hbm [shape: bf16[32,128], index: 1, kind: input, shape index: {}]   ;;  %s1543_s2 = inlined_call_operand.vmem [shape: f32[1,128], index: 2, kind: input, shape index: {}]   ;;  %s1544_s3 = inlined_call_operand.hbm [shape: bf16[128,32], index: 3, kind: input, shape index: {}]   ;;  %s1545_s4 = inlined_call_operand.vmem [shape: f32[1,32], index: 4, kind: input, shape index: {}]   ;;  %s1546_s5 = inlined_call_operand.hbm [shape: bf16[32,128], index: 5, kind: input, shape index: {}]   ;;  %s1547_s6 = inlined_call_operand.vmem [shape: f32[1,128], index: 6, kind: input, shape index: {}]   ;;  %s1548_s7 = inlined_call_operand.hbm [shape: bf16[128,32], index: 7, kind: input, shape index: {}]   ;;  %s1549_s8 = inlined_call_operand.vmem [shape: f32[1,32], index: 8, kind: input, shape index: {}]   ;;  %s1550_s9 = inlined_call_operand.vmem [shape: bf16[2,8,32], index: 9, kind: output, shape index: {0}]   ;;  %s1551_s10 = inlined_call_operand.vmem [shape: bf16[2,8,32], index: 10, kind: output, shape index: {1}]  }
   0x1   :  { %1553 = sst [smem:[#allocation14_spill]] %s1542_s1 }
   0x2   :  { %1554 = sst [smem:[#allocation15_spill]] %s1544_s3 }
   0x3   :  { %1555 = sst [smem:[#allocation16_spill]] %s1546_s5 }
   0x4   :  { %1556 = sst [smem:[#allocation17_spill]] %s1548_s7 }
   0x5   :  { %16 = vsyncpa [#allocation3], 0 }
   0x6   :  { %18 = vsyncpa [#allocation3 + $0x1], 0 }
   0x7   :  { %19 = vsyncpa [#allocation5], 0 }
   0x8   :  { %20 = vsyncpa [#allocation8], 0  ;;  %s1387_s13 = smov 0   ;;  %s1389_s14 = smov 0  }
   0x9   :  { %s1391_s15 = smov 0   ;;  %s1393_s16 = smov 0  }
   0xa   :  { %s1395_s17 = smov 0   ;;  %s1397_s18 = smov 0  }
   0xb LB: > { %s892_s19 = sadd.s32 4294967295, %s1324_s18   ;;  %p894_p0 = scmp.ge.s32.totalorder %s1324_s18, 1  ;;  %s1324_s18 = sphi %s1397_s18, %s26_s18   ;;  %s1320_s17 = sphi %s1395_s17, %s1572_s17   ;;  %s1316_s16 = sphi %s1393_s16, %s1571_s16   ;;  %s1312_s15 = sphi %s1391_s15, %s1570_s15   ;;  %s1308_s14 = sphi %s1389_s14, %s1569_s14   ;;  %s1304_s13 = sphi %s1387_s13, %s1568_s13  }
   0xc   : > { %p1419_p1 = scmp.eq.s32.totalorder %s892_s19, 0  ;;  %p295_p2 = scmp.lt.s32.totalorder %s1324_s18, 3 }
   0xd   : > { %s1558_s1 = sld [smem:[#allocation14_spill]]  ;;  %s1326_s25 = smov [#allocation4]  }
   0xe   : > { %p1427_p3 = pnand %p894_p0, %p295_p2  ;;  %s308_s26 = sshll.u32 %s1326_s25, 4  ;;  %s309_s26 = int_to_ptr.vmem [resolvable:$true] %s308_s26 }
   0xf   : > { %s1561_s5 = sld [smem:[#allocation16_spill]]  ;;  %s1327_s11 = smov 64  }
  0x10   : > { %p1032_p4 = pneg %p1427_p3  ;;  %s1328_s12 = smov 4  }
  0x11   : > { %s1329_s19 = smov [#allocation7]   ;;  %s1562_s3 = sld [smem:[#allocation15_spill]] }
  0x12   : > { %p1435_p5 = pnand %p1032_p4, %p1419_p1  ;;  %s342_s21 = sshll.u32 %s1329_s19, 4  ;;  %s343_s21 = int_to_ptr.vmem [resolvable:$true] %s342_s21 }
  0x13   : > { %s306_s23 = sshll.u32 %s1558_s1, 4  ;;  %s1563_s7 = sld [smem:[#allocation17_spill]]  ;;  %s307_s23 = int_to_ptr.hbm [resolvable:$true] %s306_s23 }
  0x14   : > { %1035 = dma.hbm_to_vmem [thread:$0]  (!%p1435_p5), %s307_s23, 256, %s309_s26, [#allocation5], %s1327_s11, %s1327_s11, %s1328_s12  }
  0x15   : > { %s340_s30 = sshll.u32 %s1561_s5, 4  ;;  %s1330_s26 = smov [#allocation6]   ;;  %s341_s30 = int_to_ptr.hbm [resolvable:$true] %s340_s30 }
  0x16   : > { %1041 = dma.hbm_to_vmem [thread:$0]  (!%p1435_p5), %s341_s30, 256, %s343_s21, [#allocation8], %s1327_s11, %s1327_s11, %s1328_s12  }
  0x17   : > { %s323_s1 = sshll.u32 %s1562_s3, 4  ;;  %s325_s19 = sshll.u32 %s1330_s26, 4  ;;  %s324_s1 = int_to_ptr.hbm [resolvable:$true] %s323_s1  ;;  %s326_s19 = int_to_ptr.vmem [resolvable:$true] %s325_s19 }
  0x18   : > { %1038 = dma.hbm_to_vmem [thread:$0]  (!%p1435_p5), %s324_s1, 1024, %s326_s19, [#allocation5], %s1327_s11, %s1327_s11, %s1328_s12  }
  0x19   : > { %s357_s23 = sshll.u32 %s1563_s7, 4  ;;  %s1331_s22 = smov [#allocation9]   ;;  %s358_s23 = int_to_ptr.hbm [resolvable:$true] %s357_s23 }
  0x1a   : > { %s359_s25 = sshll.u32 %s1331_s22, 4  ;;  %s38_s30 = sadd.s32 1, %s1320_s17  ;;  %s360_s25 = int_to_ptr.vmem [resolvable:$true] %s359_s25 }
  0x1b   : > { %1044 = dma.hbm_to_vmem [thread:$0]  (!%p1435_p5), %s358_s23, 1024, %s360_s25, [#allocation8], %s1327_s11, %s1327_s11, %s1328_s12  }
  0x1c   : > { %s47_s21 = sadd.s32 1, %s1312_s15  ;;  %p40_p6 = scmp.ge.s32.totalorder %s38_s30, 2 }
  0x1d   : > { %p54_p7 = scmp.ne.s32.totalorder %s1312_s15, %s1308_s14  ;;  %p55_p8 = scmp.eq.s32.totalorder %s1324_s18, 0 }
  0x1e   : > { %p60_p9 = scmp.ne.s32.totalorder %s1308_s14, %s1304_s13  ;;  %s1574_s30 = smov (%p40_p6, %s38_s30), 0 }
  0x1f   : > { %1564 = sst [smem:[#allocation13_spill]] %s1574_s30  ;;  %p1465_p10 = por %p55_p8, %p54_p7 }
  0x20   : > { %p1471_p11 = por %p1419_p1, %p60_p9  ;;  %s42_s27 = ssub.s32 %s1320_s17, %s1574_s30 }
  0x21   : > { %p1053_p12 = scmp.lt.s32.totalorder %s1324_s18, 2  ;;  %p45_p13 = scmp.eq.s32.totalorder %s42_s27, 0 }
  0x22   : > { %s376_s11 = sand.u32 1, %s1312_s15   ;;  %s901_s13 = sshll.u32 %s1320_s17, 3 }
  0x23   : > { %s900_s12 = sshll.u32 %s376_s11, 3  ;;  %s385_s19 = scalar_lea.hbm %s1541_s0, %s901_s13 }
  0x24   : > { %s1480_s29 = scalar_select %p45_p13, %s1312_s15, %s47_s21  }
  0x25   : > { %s380_s22 = scalar_lea.vmem [#allocation2], %s900_s12  ;;  %s387_s3 = sshll.u32 %s385_s19, 4  ;;  %s388_s3 = int_to_ptr.hbm [resolvable:$true] %s387_s3 }
  0x26   : > { %s389_s25 = sshll.u32 %s380_s22, 4  ;;  %p1046_p0 = pnand %p1053_p12, %p1465_p10  ;;  %s390_s25 = int_to_ptr.vmem [resolvable:$true] %s389_s25 }
  0x27   : > { %s377_s5 = scalar_lea.sflag [#allocation3], %s376_s11  ;;  %398 = sbr.rel (%p1427_p3) target bundleno = 335 (0x14f), region = 56 }
  0x28   : > { %1048 = dma.hbm_to_vmem [thread:$0]  (!%p1046_p0), %s388_s3, 128, %s390_s25, %s377_s5  }
  0x29   : > { %s400_s21 = sand.u32 (!%p1427_p3), 1, %s1308_s14  }
  0x2a   : > { %s903_s27 = sshll.u32 (!%p1427_p3), %s400_s21, 3  ;;  %s401_s7 = scalar_lea.sflag (!%p1427_p3), [#allocation3], %s400_s21 }
  0x2b   : > { %s404_s30 = scalar_lea.vmem (!%p1427_p3), [#allocation2], %s903_s27 }
  0x2c   : > { %1291 = dma.done.wait (%p1471_p11), %s401_s7, 128  }
  0x2d   : > { %1293 = vsyncadd (%p1471_p11), %s401_s7, 4294967168 }
  0x2e   : > { %1295 = dma.done.wait (%p1419_p1), [#allocation5], 1280  }
  0x2f   : > { %1297 = vsyncadd (%p1419_p1), [#allocation5], 4294966016 }
  0x30   : > { %1299 = dma.done.wait (%p1419_p1), [#allocation8], 1280  }
  0x31   : > { %1301 = vsyncadd (%p1419_p1), [#allocation8], 4294966016  ;;  %v1005_v0 = vld [vmem:[#allocation7 + $0x8] sm:$0xff]  ;;  %v995_v1 = vld [vmem:[#allocation4 + $0x8] sm:$0xff]  ;;  %vm508_vm0 = vcmask 261120   ;;  %p471_p1 = scmp.lt.s32.totalorder %s1316_s16, 1 }
  0x32   : > { %v1004_v2 = vld [vmem:[#allocation7] sm:$0xff]  ;;  %v1003_v3 = vld [vmem:[#allocation6 + $0x38] sm:$0xff]  ;;  %637 = vmatpush.bf16.msra.mxu2 %v1005_v0  ;;  %518 = vmatpush.bf16.msra.mxu0 %v995_v1  ;;  %v994_v5 = vld [vmem:[#allocation4] sm:$0xff]  ;;  %vm609_vm1 = vcmask 257024  }
  0x33   : > { %v486_v4 = vld [vmem:[%s404_s30] sm:$0xff]  ;;  %595 = vmatpush.bf16.msra.mxu1 %v1003_v3  ;;  %v1002_v7 = vld [vmem:[#allocation6 + $0x30] sm:$0xff]  ;;  %v1011_v11 = vld [vmem:[#allocation9 + $0x28] sm:$0xff]  ;;  %s1576_s16 = smov (!%p471_p1, %s1316_s16), 1 }
  0x34   : > { %v1013_v6 = vld [vmem:[#allocation9 + $0x38] sm:$0xff]  ;;  %v1012_v8 = vld [vmem:[#allocation9 + $0x30] sm:$0xff]  ;;  %v487_v9 = vpack.c.bf16 %v486_v4, %v486_v4  ;;  %v1010_v13 = vld [vmem:[#allocation9 + $0x20] sm:$0xff]  ;;  %s908_s28 = sshll.u32 %s1576_s16, 2 }
  0x35   : > { %714 = vmatpush.bf16.msra.mxu3 %v1013_v6  ;;  %v1001_v10 = vld [vmem:[#allocation6 + $0x28] sm:$0xff]  ;;  %v1000_v12 = vld [vmem:[#allocation6 + $0x20] sm:$0xff]  ;;  %v999_v14 = vld [vmem:[#allocation6 + $0x18] sm:$0xff]  ;;  %s477_s12 = scalar_lea.vmem %s1550_s9, %s908_s28  ;;  %s484_s16 = scalar_lea.vmem %s1551_s10, %s908_s28 }
  0x36   : > { %638 = vmatpush.bf16.msra.mxu2 %v1004_v2  ;;  %519 = vmatpush.bf16.msra.mxu0 %v994_v5  ;;  %v1009_v15 = vld [vmem:[#allocation9 + $0x18] sm:$0xff]  ;;  %v998_v16 = vld [vmem:[#allocation6 + $0x10] sm:$0xff]  ;;  %v1008_v17 = vld [vmem:[#allocation9 + $0x10] sm:$0xff] }
  0x37   : > { %596 = vmatpush.bf16.msra.mxu1 %v1002_v7  ;;  %v997_v18 = vld [vmem:[#allocation6 + $0x8] sm:$0xff]  ;;  %v1007_v19 = vld [vmem:[#allocation9 + $0x8] sm:$0xff]  ;;  %v996_v20 = vld [vmem:[#allocation6] sm:$0xff] }
  0x38   : > { %v1006_v21 = vld [vmem:[#allocation9] sm:$0xff]  ;;  %v1112_v22 = vld [vmem:[%s1543_s2] ss:$0 sm:$0xff] }
  0x39   : > { %715 = vmatpush.bf16.msra.mxu3 %v1012_v8  ;;  %959 = vmatmul.msk.bf16.vlgmr.msra.gmra.mxu2 %vm508_vm0, %v487_v9  ;;  %v1113_v26 = vld [vmem:[%s1547_s6] ss:$0 sm:$0xff] }
  0x3a   : > { %918 = vmatmul.msk.bf16.vlgmr.msra.gmra.mxu0 %vm508_vm0, %v487_v9  ;;  %v1114_v34 = vld [vmem:[%s1545_s4] ss:$0 sm:$0xff] }
  0x3b   : > { %597 = vmatpush.bf16.msra.mxu1 %v1001_v10  ;;  %v1115_v39 = vld [vmem:[%s1549_s8] ss:$0 sm:$0xff] }
  0x3d   : > { %716 = vmatpush.bf16.msra.mxu3 %v1011_v11 }
  0x3f   : > { %598 = vmatpush.bf16.msra.mxu1 %v1000_v12 }
  0x41   : > { %717 = vmatpush.bf16.msra.mxu3 %v1010_v13 }
  0x43   : > { %599 = vmatpush.bf16.msra.mxu1 %v999_v14 }
  0x45   : > { %718 = vmatpush.bf16.msra.mxu3 %v1009_v15 }
  0x47   : > { %600 = vmatpush.bf16.msra.mxu1 %v998_v16 }
  0x49   : > { %719 = vmatpush.bf16.msra.mxu3 %v1008_v17 }
  0x4b   : > { %601 = vmatpush.bf16.msra.mxu1 %v997_v18 }
  0x4d   : > { %720 = vmatpush.bf16.msra.mxu3 %v1007_v19 }
  0x4f   : > { %602 = vmatpush.bf16.msra.mxu1 %v996_v20 }
  0x51   : > { %721 = vmatpush.bf16.msra.mxu3 %v1006_v21 }
  0xb7   : > { %v521_v23 = vpop.f32.mrf.mxu0 }
  0xb8   : > { %v522_v24 = vadd.f32 %v1112_v22, %v521_v23 }
  0xba   : > { %v525_v25 = vmax.f32 %v522_v24, 0.0 }
  0xbc   : > { %v526_v27 = vpack.c.bf16 %v525_v25, %v525_v25  ;;  %v640_v28 = vpop.f32.mrf.mxu2 }
  0xbd   : > { %v641_v29 = vadd.f32 %v1113_v26, %v640_v28 }
  0xbe   : > { %603 = vmatmul.bf16.vlgmr.msra.gmra.mxu1 %v526_v27 }
  0xbf   : > { %v523_v30 = vpop.f32.mrf.mxu0  ;;  %v644_v31 = vmax.f32 %v641_v29, 0.0 }
  0xc1   : > { %v645_v32 = vpack.c.bf16 %v644_v31, %v644_v31 }
  0xc3   : > { %722 = vmatmul.bf16.vlgmr.msra.gmra.mxu3 %v645_v32 }
  0xc4   : > { %v642_v33 = vpop.f32.mrf.mxu2 }
 0x13b   : > { %v604_v35 = vpop.f32.mrf.mxu1 }
 0x13c   : > { %v605_v36 = vadd.f32 %v1114_v34, %v604_v35 }
 0x13e   : > { %v608_v37 = vpack.c.bf16 %v605_v36, %v605_v36 }
 0x140   : > { %610 = vst.msk [vmem:[%s477_s12] sm:$0xf] %vm609_vm1, %v608_v37 }
 0x143   : > { %v606_v38 = vpop.f32.mrf.mxu1 }
 0x146   : > { %v723_v40 = vpop.f32.mrf.mxu3 }
 0x147   : > { %v724_v41 = vadd.f32 %v1115_v39, %v723_v40 }
 0x149   : > { %v727_v42 = vpack.c.bf16 %v724_v41, %v724_v41 }
 0x14b   : > { %728 = vst.msk [vmem:[%s484_s16] sm:$0xf] %vm609_vm1, %v727_v42 }
 0x14e   : > { %v725_v43 = vpop.f32.mrf.mxu3 }
 0x14f PF: > { %s26_s18 = sadd.s32 1, %s1324_s18   ;;  %s1567_s22 = sld [smem:[#allocation13_spill]] }
 0x150   : > { %p23_p2 = scmp.ge.s32.totalorder %s26_s18, 4   ;;  %s1568_s13 = smov %s1308_s14 }
 0x151   : > { %s1569_s14 = smov %s1312_s15  ;;  %s1570_s15 = smov %s1480_s29 }
 0x152   : > { %s1571_s16 = smov %s1320_s17  ;;  %25 = sbr.rel (!%p23_p2) target bundleno = 11 (0xb), region = 124 }
 0x155   : > { %s1572_s17 = smov %s1567_s22 }
 0x157   :  { %774 = vsyncpa [#allocation3], 1 }
 0x158   :  { %776 = vsyncpa [#allocation3 + $0x1], 1 }
 0x159   :  { %777 = vsyncpa [#allocation5], 1 }
 0x15a   :  { %778 = vsyncpa [#allocation8], 1 }

</bundles_post_ra>
